<compile_context>
chip_gen: v5e
topology: v5e:2x2
jax: 0.10.0
libtpu: 0.0.40
codegen_flags: <defaults>
</compile_context>

<pallas_src>
import jax
import jax.numpy as jnp
from jax.experimental import pallas as pl
from jax.experimental.pallas import tpu as pltpu

_MiB = 1024 * 1024


# --------------------------------------------------------------------------
# Kernels
# --------------------------------------------------------------------------
def _make_kernel(has_bias, direct_out):
    """Build the grid-(m, n, k) matmul kernel.

    direct_out=True  -> out_dtype is f32: accumulate straight into o_ref.
    direct_out=False -> accumulate in an f32 VMEM scratch, cast on last k.
    """
    if direct_out:

        def kernel(*refs):
            if has_bias:
                x_ref, w_ref, b_ref, o_ref = refs
            else:
                x_ref, w_ref, o_ref = refs
            k = pl.program_id(2)

            @pl.when(k == 0)
            def _():
                o_ref[...] = jnp.zeros_like(o_ref)

            # x: (tm, tk) @ w: (tk, tn) -> (tm, tn), f32 accumulation on MXU.
            o_ref[...] += jnp.dot(
                x_ref[...], w_ref[...], preferred_element_type=jnp.float32
            )

            if has_bias:

                @pl.when(k == pl.num_programs(2) - 1)
                def _():
                    # Bias is not sharded; added once after the K reduction.
                    o_ref[...] += b_ref[...]

    else:

        def kernel(*refs):
            if has_bias:
                x_ref, w_ref, b_ref, o_ref, acc_ref = refs
            else:
                x_ref, w_ref, o_ref, acc_ref = refs
            k = pl.program_id(2)

            @pl.when(k == 0)
            def _():
                acc_ref[...] = jnp.zeros_like(acc_ref)

            acc_ref[...] += jnp.dot(
                x_ref[...], w_ref[...], preferred_element_type=jnp.float32
            )

            @pl.when(k == pl.num_programs(2) - 1)
            def _():
                r = acc_ref[...]
                if has_bias:
                    r = r + b_ref[...]
                o_ref[...] = r.astype(o_ref.dtype)

    return kernel


# --------------------------------------------------------------------------
# Tiling helpers
# --------------------------------------------------------------------------
def _round_up(x, m):
    return ((x + m - 1) // m) * m


def _pick_tile(dim, want, align):
    """Largest tile <= want that divides `dim` and is a multiple of `align`.

    `dim` must already be a multiple of `align`, so the search always succeeds
    (worst case returns `align`) and can never return an oversized full extent.
    """
    if dim <= want:
        return dim
    t = (min(want, dim) // align) * align
    while t > align:
        if dim % t == 0:
            return t
        t -= align
    return align


def _fit(dim, want, align):
    """Pad `dim` up to `align`, then pick a divisor tile <= want."""
    d = _round_up(dim, align)
    return _pick_tile(d, want, align), d


def _vmem_capacity_bytes():
    try:
        cap = int(getattr(pltpu.get_tpu_info(), "vmem_capacity_bytes", 0))
        if cap > 0:
            return cap
    except Exception:
        pass
    return 64 * _MiB  # conservative (v7x-like) when the query is unavailable


# --------------------------------------------------------------------------
# Wrapper
# --------------------------------------------------------------------------
def row_parallel_linear(
    x,
    weight,
    bias=None,
    *,
    tm=None,
    tn=None,
    tk=None,
    compute_dtype=jnp.bfloat16,
    out_dtype=None,
):
    """Forward of RowParallelLinear (world_size == 1): Y = X @ W.T + b.

    x: (..., K); weight: (N, K) in the native PyTorch layout; bias: (N,)/None.
    NOTE: activations and weights are cast to bf16 for the MXU with f32
    accumulation (the standard mixed-precision recipe).
    """
    K = x.shape[-1]
    N, Kw = weight.shape
    if K != Kw:
        raise ValueError("in_features mismatch")
    lead = x.shape[:-1]
    M = 1
    for d in lead:
        M *= int(d)
    M = max(M, 1)
    out_dtype = x.dtype if out_dtype is None else out_dtype
    has_bias = bias is not None
    direct_out = jnp.dtype(out_dtype) == jnp.dtype(jnp.float32)

    # ---- generation-aware tile defaults ---------------------------------
    vmem_cap = _vmem_capacity_bytes()
    if vmem_cap >= 100 * _MiB:
        # v5e/v6e (128 MiB VMEM): chase arithmetic intensity.
        tm_d, tn_d, tk_d = 1024, 2048, 2048
    else:
        # v7x (64 MiB VMEM/TC): small footprint, ridge already met.
        tm_d, tn_d, tk_d = 512, 1024, 1024
    tm = tm_d if tm is None else tm
    tn = tn_d if tn is None else tn
    tk = tk_d if tk is None else tk

    # ---- tile selection + padding (lane-aligned N/K, bf16-packed M) -----
    tk_, K_pad = _fit(K, tk, 128)
    tn_, N_pad = _fit(N, tn, 128)
    tm_, M_pad = _fit(M, tm, 16)

    # Megacore guard (v7x: 2 TCs): keep >=2 steps on a parallel axis.
    if M_pad // tm_ == 1 and N_pad // tn_ == 1 and N_pad >= 256:
        tn_ = _pick_tile(N_pad, max(128, tn_ // 2), 128)

    grid = (M_pad // tm_, N_pad // tn_, K_pad // tk_)

    # ---- operand preparation ---------------------------------------------
    # TODO(synk): in a real model cache this transposed/padded bf16 weight
    # across calls (it is a reused constant; XLA folds it at most once here).
    w_kn = weight.astype(compute_dtype).T  # (K, N): standard (1,0) contraction
    if (K_pad, N_pad) != (K, N):
        w_kn = jnp.pad(w_kn, ((0, K_pad - K), (0, N_pad - N)))

    x2d = x.reshape(M, K).astype(compute_dtype)
    if (M_pad, K_pad) != (M, K):
        x2d = jnp.pad(x2d, ((0, M_pad - M), (0, K_pad - K)))  # zero K-pad exact

    operands = [x2d, w_kn]
    in_specs = [
        pl.BlockSpec((tm_, tk_), lambda i, j, k: (i, k)),  # X tile
        pl.BlockSpec((tk_, tn_), lambda i, j, k: (k, j)),  # W tile (K, N)
    ]
    if has_bias:
        b2d = bias.astype(jnp.float32).reshape(1, N)
        if N_pad != N:
            b2d = jnp.pad(b2d, ((0, 0), (0, N_pad - N)))
        operands.append(b2d)
        in_specs.append(pl.BlockSpec((1, tn_), lambda i, j, k: (0, j)))

    scratch_shapes = [] if direct_out else [pltpu.VMEM((tm_, tn_), jnp.float32)]

    # ---- VMEM budget: double-buffered inputs/outputs + optional f32 acc ----
    cb = jnp.dtype(compute_dtype).itemsize
    ob = jnp.dtype(out_dtype).itemsize
    need = (
        2 * tm_ * tk_ * cb
        + 2 * tk_ * tn_ * cb
        + 2 * tm_ * tn_ * ob
        + (0 if direct_out else tm_ * tn_ * 4)
        + (2 * tn_ * 4 if has_bias else 0)
    )
    # Leave headroom for Mosaic internal scratch: ~54 MiB cap on 64 MiB parts,
    # ~108 MiB on 128 MiB parts.
    cap = max(32 * _MiB, (vmem_cap * 85) // 100)
    vmem_limit = int(min(max(need + need // 2, 32 * _MiB), cap))

    cost = pl.CostEstimate(
        flops=2 * M * N * K,
        transcendentals=0,
        bytes_accessed=M * K * cb
        + K * N * cb
        + M * N * ob
        + (N * 4 if has_bias else 0),
    )

    kernel = _make_kernel(has_bias, direct_out)

    out2d = pl.pallas_call(
        kernel,
        out_shape=jax.ShapeDtypeStruct((M_pad, N_pad), out_dtype),
        grid_spec=pltpu.PrefetchScalarGridSpec(
            num_scalar_prefetch=0,
            grid=grid,
            in_specs=in_specs,
            out_specs=pl.BlockSpec((tm_, tn_), lambda i, j, k: (i, j)),
            scratch_shapes=scratch_shapes,
        ),
        compiler_params=pltpu.CompilerParams(
            dimension_semantics=("parallel", "parallel", "arbitrary"),
            vmem_limit_bytes=vmem_limit,
        ),
        cost_estimate=cost,
    )(*operands)

    if (M_pad, N_pad) != (M, N):
        out2d = out2d[:M, :N]
    return out2d.reshape(lead + (N,))


# --------------------------------------------------------------------------
# Demo / correctness check
# --------------------------------------------------------------------------
if __name__ == "__main__":
    # Small shapes consistent with the module's forward:
    # in_features=256, out_features=128, input (batch=2, seq=8, in_features).
    B, S, IN, OUT = 2, 8, 256, 128

    key = jax.random.PRNGKey(0)
    kx, kw = jax.random.split(key)

    x = jax.random.normal(kx, (B, S, IN), dtype=jnp.float32)
    # Module leaves the weight uninitialized; use a deterministic normal init.
    weight = jax.random.normal(kw, (OUT, IN), dtype=jnp.float32) * 0.02
    bias = jnp.zeros((OUT,), dtype=jnp.float32)  # module zero-inits bias

    ref = (
        jnp.einsum(
            "bsk,nk->bsn",
            x.astype(jnp.bfloat16),
            weight.astype(jnp.bfloat16),
            preferred_element_type=jnp.float32,
        )
        + bias
    )

    # f32-output path (direct accumulation into the output tile, no scratch).
    out = jax.block_until_ready(row_parallel_linear(x, weight, bias))
    assert out.shape == (B, S, OUT)
    assert jnp.allclose(out, ref.astype(x.dtype), atol=2e-3, rtol=2e-3), "bias path"

    # Bias-free kernel variant + ragged-M padding path.
    x2 = jax.random.normal(key, (1, 7, IN), dtype=jnp.float32)
    out2 = jax.block_until_ready(row_parallel_linear(x2, weight, None))
    ref2 = jnp.einsum(
        "bsk,nk->bsn",
        x2.astype(jnp.bfloat16),
        weight.astype(jnp.bfloat16),
        preferred_element_type=jnp.float32,
    )
    assert out2.shape == (1, 7, OUT)
    assert jnp.allclose(out2, ref2.astype(x2.dtype), atol=2e-3, rtol=2e-3), "no-bias"

    # bf16-output path (exercises the f32 VMEM-scratch accumulator variant).
    out3 = jax.block_until_ready(
        row_parallel_linear(x, weight, bias, out_dtype=jnp.bfloat16)
    )
    assert out3.shape == (B, S, OUT)
    assert jnp.allclose(out3.astype(jnp.float32), ref, atol=3e-2, rtol=3e-2), "bf16 out"

    print("KERNEL_OK")
</pallas_src>

<mosaic_0001>
module attributes {stable_mosaic.version = 11 : i64} {
  func.func @kernel(%arg0: i32, %arg1: i32, %arg2: i32, %arg3: memref<16x256xbf16, #tpu.memory_space<vmem>>, %arg4: memref<256x128xbf16, #tpu.memory_space<vmem>>, %arg5: memref<1x128xf32, #tpu.memory_space<vmem>>, %arg6: memref<16x128xf32, #tpu.memory_space<vmem>>) attributes {dimension_semantics = [#tpu.dimension_semantics<parallel>, #tpu.dimension_semantics<parallel>, #tpu.dimension_semantics<arbitrary>], iteration_bounds = array<i64: 1, 1, 1>, scalar_prefetch = 0 : i64, scratch_operands = 0 : i64, tpu.core_type = #tpu.core_type<tc>, window_params = [{transform_indices = @transform_0, window_bounds = array<i64: 16, 256>}, {transform_indices = @transform_1, window_bounds = array<i64: 256, 128>}, {transform_indices = @transform_2, window_bounds = array<i64: 1, 128>}, {transform_indices = @transform_3, window_bounds = array<i64: 16, 128>}]} {
    %c0_i32 = arith.constant 0 : i32
    %0 = arith.cmpi eq, %arg2, %c0_i32 : i32
    %1 = arith.extui %0 : i1 to i32
    %c0_i32_0 = arith.constant 0 : i32
    %2 = arith.cmpi ne, %1, %c0_i32_0 : i32
    scf.if %2 {
      %cst_10 = arith.constant 0.000000e+00 : f32
      %12 = vector.broadcast %cst_10 : f32 to vector<16x128xf32>
      %c0_11 = arith.constant 0 : index
      %c0_12 = arith.constant 0 : index
      %13 = vector.load %arg6[%c0_11, %c0_12] : memref<16x128xf32, #tpu.memory_space<vmem>>, vector<16x128xf32>
      tpu.vector_store %arg6[%c0_11, %c0_12], %12 {strides = array<i32>} : memref<16x128xf32, #tpu.memory_space<vmem>>, vector<16x128xf32>,
    } else {
    }
    %c0 = arith.constant 0 : index
    %c0_1 = arith.constant 0 : index
    %3 = vector.load %arg6[%c0, %c0_1] : memref<16x128xf32, #tpu.memory_space<vmem>>, vector<16x128xf32>
    %c0_2 = arith.constant 0 : index
    %c0_3 = arith.constant 0 : index
    %4 = vector.load %arg3[%c0_2, %c0_3] : memref<16x256xbf16, #tpu.memory_space<vmem>>, vector<16x256xbf16>
    %c0_4 = arith.constant 0 : index
    %c0_5 = arith.constant 0 : index
    %5 = vector.load %arg4[%c0_4, %c0_5] : memref<256x128xbf16, #tpu.memory_space<vmem>>, vector<256x128xbf16>
    %cst = arith.constant dense<0.000000e+00> : vector<16x128xf32>
    %6 = tpu.matmul %4, %5, %cst {dimension_numbers = #tpu.dot_dimension_numbers<[1], [0], [0], [1], [0, 0, 1, 1], [], []>} : vector<16x256xbf16>, vector<256x128xbf16>, vector<16x128xf32> -> vector<16x128xf32>
    %7 = arith.addf %3, %6 : vector<16x128xf32>
    %c0_6 = arith.constant 0 : index
    %c0_7 = arith.constant 0 : index
    %8 = vector.load %arg6[%c0_6, %c0_7] : memref<16x128xf32, #tpu.memory_space<vmem>>, vector<16x128xf32>
    tpu.vector_store %arg6[%c0_6, %c0_7], %7 {strides = array<i32>} : memref<16x128xf32, #tpu.memory_space<vmem>>, vector<16x128xf32>,
    %c0_i32_8 = arith.constant 0 : i32
    %9 = arith.cmpi eq, %arg2, %c0_i32_8 : i32
    %10 = arith.extui %9 : i1 to i32
    %c0_i32_9 = arith.constant 0 : i32
    %11 = arith.cmpi ne, %10, %c0_i32_9 : i32
    scf.if %11 {
      %c0_10 = arith.constant 0 : index
      %c0_11 = arith.constant 0 : index
      %12 = vector.load %arg6[%c0_10, %c0_11] : memref<16x128xf32, #tpu.memory_space<vmem>>, vector<16x128xf32>
      %c0_12 = arith.constant 0 : index
      %c0_13 = arith.constant 0 : index
      %13 = vector.load %arg5[%c0_12, %c0_13] : memref<1x128xf32, #tpu.memory_space<vmem>>, vector<1x128xf32>
      %14 = vector.broadcast %13 : vector<1x128xf32> to vector<16x128xf32>
      %15 = arith.addf %12, %14 : vector<16x128xf32>
      %c0_14 = arith.constant 0 : index
      %c0_15 = arith.constant 0 : index
      %16 = vector.load %arg6[%c0_14, %c0_15] : memref<16x128xf32, #tpu.memory_space<vmem>>, vector<16x128xf32>
      tpu.vector_store %arg6[%c0_14, %c0_15], %15 {strides = array<i32>} : memref<16x128xf32, #tpu.memory_space<vmem>>, vector<16x128xf32>,
    } else {
    }
    return
  }
  func.func @transform_0(%arg0: i32, %arg1: i32, %arg2: i32) -> (i32, i32) {
    %c0_i32 = arith.constant 0 : i32
    return %arg0, %arg2 : i32, i32
  }
  func.func @transform_1(%arg0: i32, %arg1: i32, %arg2: i32) -> (i32, i32) {
    %c0_i32 = arith.constant 0 : i32
    return %arg2, %arg1 : i32, i32
  }
  func.func @transform_2(%arg0: i32, %arg1: i32, %arg2: i32) -> (i32, i32) {
    %c0_i32 = arith.constant 0 : i32
    %c0_i32_0 = arith.constant 0 : i32
    return %c0_i32, %arg1 : i32, i32
  }
  func.func @transform_3(%arg0: i32, %arg1: i32, %arg2: i32) -> (i32, i32) {
    %c0_i32 = arith.constant 0 : i32
    return %arg0, %arg1 : i32, i32
  }
}

</mosaic_0001>

<bundles_post_ra>
// kernel: tpu_custom_call.1
= control target key start
LH: loop header
LB: loop body
LE: loop exit
PB: predicated region body
PF: predicated region fallthrough
CT: control target
= control target key end

     0   :  { %8 = vsyncpa [#allocation3], 0  ;;  %s482_s0 = inlined_call_operand.hbm [shape: bf16[16,256], index: 0, kind: input, shape index: {}]   ;;  %s483_s1 = inlined_call_operand.hbm [shape: bf16[256,128], index: 1, kind: input, shape index: {}]   ;;  %s484_s2 = inlined_call_operand.vmem [shape: f32[1,128], index: 2, kind: input, shape index: {}]   ;;  %s485_s3 = inlined_call_operand.hbm [shape: f32[16,128], index: 3, kind: output, shape index: {}]  }
   0x1   :  { %9 = vsyncpa [#allocation6], 0 }
   0x2   :  { %10 = vsyncpa [#allocation4], 0  ;;  %s15_s14 = sshll.u32 %s482_s0, 4  ;;  %s437_s15 = smov [#allocation2]   ;;  %s16_s14 = int_to_ptr.hbm [resolvable:$true] %s15_s14 }
   0x3   :  { %s17_s16 = sshll.u32 %s437_s15, 4  ;;  %s28_s19 = sshll.u32 %s483_s1, 4  ;;  %s18_s16 = int_to_ptr.vmem [resolvable:$true] %s17_s16  ;;  %s29_s19 = int_to_ptr.hbm [resolvable:$true] %s28_s19 }
   0x4   :  { %s438_s20 = smov 128   ;;  %s439_s21 = smov 8  }
   0x5   :  { %23 = dma.hbm_to_vmem [thread:$0]  %s16_s14, 256, %s18_s16, [#allocation3], %s438_s20, %s438_s20, %s439_s21  }
   0x6   :  { %s440_s22 = smov [#allocation5]   ;;  %s441_s24 = smov 64  }
   0x7   :  { %s30_s23 = sshll.u32 %s440_s22, 4  ;;  %s442_s0 = smov 4   ;;  %s31_s23 = int_to_ptr.vmem [resolvable:$true] %s30_s23 }
   0x8   :  { %36 = dma.hbm_to_vmem [thread:$0]  %s29_s19, 2048, %s31_s23, [#allocation6], %s441_s24, %s441_s24, %s442_s0  }
   0x9   :  { %431 = dma.done.wait [#allocation3], 256  }
   0xa   :  { %432 = vsyncadd [#allocation3], 4294967040 }
   0xb   :  { %433 = dma.done.wait [#allocation6], 2048  }
   0xc   :  { %434 = vsyncadd [#allocation6], 4294965248  ;;  %v341_v0 = vld [vmem:[#allocation5 + $0x38] sm:$0xff]  ;;  %v340_v2 = vld [vmem:[#allocation5 + $0x30] sm:$0xff]  ;;  %s443_s26 = smov [#allocation7]   ;;  %s246_s30 = sshll.u32 %s485_s3, 4  ;;  %s247_s30 = int_to_ptr.hbm [resolvable:$true] %s246_s30 }
   0xd   :  { %v349_v1 = vld [vmem:[#allocation5 + $0x78] sm:$0xff]  ;;  %195 = vmatpush.bf16.msra.mxu0 %v341_v0  ;;  %v348_v3 = vld [vmem:[#allocation5 + $0x70] sm:$0xff]  ;;  %v339_v4 = vld [vmem:[#allocation5 + $0x28] sm:$0xff]  ;;  %s244_s27 = sshll.u32 %s443_s26, 4  ;;  %s245_s27 = int_to_ptr.vmem [resolvable:$true] %s244_s27 }
   0xe   :  { %209 = vmatpush.bf16.msra.mxu1 %v349_v1  ;;  %v347_v5 = vld [vmem:[#allocation5 + $0x68] sm:$0xff]  ;;  %v338_v6 = vld [vmem:[#allocation5 + $0x20] sm:$0xff]  ;;  %v337_v8 = vld [vmem:[#allocation5 + $0x18] sm:$0xff] }
   0xf   :  { %v346_v7 = vld [vmem:[#allocation5 + $0x60] sm:$0xff]  ;;  %v345_v9 = vld [vmem:[#allocation5 + $0x58] sm:$0xff]  ;;  %v336_v10 = vld [vmem:[#allocation5 + $0x10] sm:$0xff] }
  0x10   :  { %v344_v11 = vld [vmem:[#allocation5 + $0x50] sm:$0xff]  ;;  %v335_v12 = vld [vmem:[#allocation5 + $0x8] sm:$0xff]  ;;  %v334_v14 = vld [vmem:[#allocation5] sm:$0xff] }
  0x11   :  { %196 = vmatpush.bf16.msra.mxu0 %v340_v2  ;;  %v343_v13 = vld [vmem:[#allocation5 + $0x48] sm:$0xff]  ;;  %v342_v15 = vld [vmem:[#allocation5 + $0x40] sm:$0xff]  ;;  %v262_v16 = vld [vmem:[#allocation2] sm:$0xf] }
  0x12   :  { %210 = vmatpush.bf16.msra.mxu1 %v348_v3  ;;  %v333_v17 = vld [vmem:[#allocation2 + $0x4] sm:$0xf0]  ;;  %v332_v18 = vld [vmem:[#allocation2 + $0x4] sm:$0xf]  ;;  %v264_v19 = vld [vmem:[#allocation2 + $0x8] sm:$0xf0] }
  0x13   :  { %v263_v20 = vor.u32 %v333_v17, %v262_v16  ;;  %v267_v21 = vor.u32 %v332_v18, %v264_v19  ;;  %v358_v25 = vld [vmem:[%s484_s2] ss:$0 sm:$0xff] }
  0x15   :  { %197 = vmatpush.bf16.msra.mxu0 %v339_v4 }
  0x16   :  { %211 = vmatpush.bf16.msra.mxu1 %v347_v5 }
  0x19   :  { %198 = vmatpush.bf16.msra.mxu0 %v338_v6 }
  0x1a   :  { %212 = vmatpush.bf16.msra.mxu1 %v346_v7 }
  0x1d   :  { %199 = vmatpush.bf16.msra.mxu0 %v337_v8 }
  0x1e   :  { %213 = vmatpush.bf16.msra.mxu1 %v345_v9 }
  0x21   :  { %200 = vmatpush.bf16.msra.mxu0 %v336_v10 }
  0x22   :  { %214 = vmatpush.bf16.msra.mxu1 %v344_v11 }
  0x25   :  { %201 = vmatpush.bf16.msra.mxu0 %v335_v12 }
  0x26   :  { %215 = vmatpush.bf16.msra.mxu1 %v343_v13 }
  0x29   :  { %202 = vmatpush.bf16.msra.mxu0 %v334_v14 }
  0x2a   :  { %216 = vmatpush.bf16.msra.mxu1 %v342_v15 }
  0x2c   :  { %203 = vmatmul.bf16.vlgmr.msra.gmra.mxu0 %v263_v20 }
  0x2d   :  { %217 = vmatmul.bf16.vlgmr.msra.gmra.mxu1 %v267_v21 }
  0xa9   :  { %v204_v22 = vpop.f32.mrf.mxu0 }
  0xaa   :  { %v218_v23 = vpop.f32.mrf.mxu1 }
  0xab   :  { %v219_v24 = vadd.f32 %v218_v23, %v204_v22 }
  0xad   :  { %v236_v26 = vadd.f32 %v358_v25, %v219_v24 }
  0xaf   :  { %238 = vst [vmem:[#allocation7] sm:$0xff] %v236_v26 }
  0xb1   :  { %v206_v27 = vpop.f32.mrf.mxu0 }
  0xb2   :  { %v220_v28 = vpop.f32.mrf.mxu1 }
  0xb3   :  { %v221_v29 = vadd.f32 %v220_v28, %v206_v27 }
  0xb5   :  { %v237_v30 = vadd.f32 %v358_v25, %v221_v29 }
  0xb7   :  { %239 = vst [vmem:[#allocation7 + $0x8] sm:$0xff] %v237_v30 }
  0xb8   :  { %252 = dma.vmem_to_hbm [thread:$0]  %s245_s27, 256, %s247_s30, [#allocation4], %s438_s20, %s438_s20, %s439_s21  }
  0xb9   :  { %435 = dma.done.wait [#allocation4], 256  }
  0xba   :  { %436 = vsyncadd [#allocation4], 4294967040 }
  0xbb   :  { %257 = vsyncpa [#allocation3], 1 }
  0xbc   :  { %258 = vsyncpa [#allocation6], 1 }
  0xbd   :  { %259 = vsyncpa [#allocation4], 1 }

</bundles_post_ra>
